<compile_context>
chip_gen: v5e
topology: v5e:2x2
jax: 0.10.0
libtpu: 0.0.40
codegen_flags: <defaults>
</compile_context>

<pallas_src>
import functools

import jax
import jax.numpy as jnp
from jax import lax
from jax.experimental import pallas as pl
from jax.experimental.pallas import tpu as pltpu


# ----------------------------------------------------------------------------
# Kernels
# ----------------------------------------------------------------------------

def odefunc_rows_kernel(y_ref, w1_ref, b1_ref, w2t_ref, b2_ref, out_ref):
    """Tiny-batch row-layout RHS: y [B,2] -> out [B,2]. Launch-overhead bound."""
    y = y_ref[...].astype(jnp.float32)        # [B, 2]
    w1 = w1_ref[...].astype(jnp.float32)      # [2, H]
    b1 = b1_ref[...].astype(jnp.float32)      # [1, H]
    w2t = w2t_ref[...].astype(jnp.float32)    # [2, H]
    b2 = b2_ref[...].astype(jnp.float32)      # [1, 2]
    # Layer 1 (K=2) as a VPU outer product; layer 2 (N=2) as 2 lane reductions.
    h = jnp.tanh(y[:, 0:1] * w1[0:1, :] + y[:, 1:2] * w1[1:2, :] + b1)
    o0 = jnp.sum(h * w2t[0:1, :], axis=-1, keepdims=True)
    o1 = jnp.sum(h * w2t[1:2, :], axis=-1, keepdims=True)
    out_ref[...] = (jnp.concatenate([o0, o1], axis=-1) + b2).astype(out_ref.dtype)


def odefunc_cols_kernel(yT_ref, w1t_ref, b1c_ref, w2c_ref, b2c_ref, outT_ref):
    """Lane-dense transposed RHS: yT [2, tile] -> outT [2, tile].

    Batch in lanes, hidden in sublanes -> unmasked full-lane stores, dense
    VPU/EUP work, 2 sublane reductions for the N=2 output layer.
    """
    yT = yT_ref[...].astype(jnp.float32)       # [2, tile]
    w1t = w1t_ref[...].astype(jnp.float32)     # [H, 2]
    b1c = b1c_ref[...].astype(jnp.float32)     # [H, 1]
    w2c = w2c_ref[...].astype(jnp.float32)     # [H, 2]
    b2c = b2c_ref[...].astype(jnp.float32)     # [2, 1]
    h = jnp.tanh(w1t[:, 0:1] * yT[0:1, :] + w1t[:, 1:2] * yT[1:2, :] + b1c)
    o0 = jnp.sum(h * w2c[:, 0:1], axis=0, keepdims=True) + b2c[0:1, :]
    o1 = jnp.sum(h * w2c[:, 1:2], axis=0, keepdims=True) + b2c[1:2, :]
    outT_ref[...] = jnp.concatenate([o0, o1], axis=0).astype(outT_ref.dtype)


def fused_euler_cols_kernel(y0T_ref, w1t_ref, b1c_ref, w2c_ref, b2c_ref, yT_ref,
                            *, n_steps, dt, unroll):
    """Whole explicit-Euler loop on one lane tile, transposed layout."""
    H = w1t_ref.shape[0]
    tile = y0T_ref.shape[1]
    dt_f = jnp.float32(dt)

    # Weights loaded ONCE; every broadcast hoisted out of the loop (JAX does
    # not CSE broadcast_in_dim) and dt folded into layer-2 weights/bias
    # (in-kernel hoist -> one VPU multiply removed from the per-step chain).
    w1c0 = jnp.broadcast_to(w1t_ref[:, 0:1].astype(jnp.float32), (H, tile))
    w1c1 = jnp.broadcast_to(w1t_ref[:, 1:2].astype(jnp.float32), (H, tile))
    b1b = jnp.broadcast_to(b1c_ref[...].astype(jnp.float32), (H, tile))
    w2c0 = jnp.broadcast_to(w2c_ref[:, 0:1].astype(jnp.float32), (H, tile)) * dt_f
    w2c1 = jnp.broadcast_to(w2c_ref[:, 1:2].astype(jnp.float32), (H, tile)) * dt_f
    db20 = jnp.broadcast_to(b2c_ref[0:1, 0:1].astype(jnp.float32), (1, tile)) * dt_f
    db21 = jnp.broadcast_to(b2c_ref[1:2, 0:1].astype(jnp.float32), (1, tile)) * dt_f

    ya = y0T_ref[0:1, :].astype(jnp.float32)   # state row 0, [1, tile]
    yb = y0T_ref[1:2, :].astype(jnp.float32)   # state row 1, [1, tile]

    def step(_, carry):
        ya, yb = carry
        # Layer 1: K=2 contraction as 2 VPU FMAs, tanh on the EUP.
        h = jnp.tanh(w1c0 * ya + w1c1 * yb + b1b)                   # [H, tile]
        # Layer 2 + Euler axpy; state carried as two lane-dense rows, no
        # per-step concat on the serial chain; exactly 2 sublane reductions.
        ya = ya + jnp.sum(h * w2c0, axis=0, keepdims=True) + db20
        yb = yb + jnp.sum(h * w2c1, axis=0, keepdims=True) + db21
        return ya, yb

    ya, yb = lax.fori_loop(0, n_steps, step, (ya, yb), unroll=unroll)
    yT_ref[...] = jnp.concatenate([ya, yb], axis=0).astype(yT_ref.dtype)


# ----------------------------------------------------------------------------
# Wrappers
# ----------------------------------------------------------------------------

_LANE = 128


def _col_params(w1, b1, w2t, b2):
    """One-off lane-dense weight layouts for the transposed kernels."""
    H = w1.shape[1]
    return w1.T, b1.reshape(H, 1), w2t.T, b2.reshape(w2t.shape[0], 1)


def odefunc_forward(t, y, w1, b1, w2t, b2, *,
                    lane_tile=65536, flat_vmem_bytes=8 << 20):
    """Pallas equivalent of ODEFunc.forward(t, y). `t` is unused (as in torch)."""
    del t
    B, DI = y.shape
    H = w1.shape[1]
    DO = w2t.shape[0]
    assert DI == 2 and DO == 2, "kernel is specialized for the 2->32->2 MLP"

    if B < _LANE:
        # Tiny batch: pure launch-overhead territory; one flat row-layout block.
        return pl.pallas_call(
            odefunc_rows_kernel,
            out_shape=jax.ShapeDtypeStruct((B, DO), y.dtype),
            in_specs=[pl.BlockSpec(memory_space=pltpu.MemorySpace.VMEM)] * 5,
            out_specs=pl.BlockSpec(memory_space=pltpu.MemorySpace.VMEM),
        )(y, w1, b1, w2t, b2)

    # Lane-dense transposed layout (batch in lanes).
    w1t, b1c, w2c, b2c = _col_params(w1, b1, w2t, b2)
    itemsize = jnp.dtype(y.dtype).itemsize
    Bp128 = pl.cdiv(B, _LANE) * _LANE
    # Flat-path working set: y + out at HBM dtype plus the [H, B] f32 hidden.
    flat_work = Bp128 * ((DI + DO) * itemsize + H * 4)

    if flat_work <= flat_vmem_bytes:
        # Whole problem fits comfortably in VMEM: single flat block, no grid
        # machinery (per-grid-step overhead ~0.35us dwarfs a few-KB tile).
        Bp = Bp128
        yT = (jnp.pad(y, ((0, Bp - B), (0, 0))) if Bp != B else y).T
        outT = pl.pallas_call(
            odefunc_cols_kernel,
            out_shape=jax.ShapeDtypeStruct((DO, Bp), y.dtype),
            in_specs=[pl.BlockSpec(memory_space=pltpu.MemorySpace.VMEM)] * 5,
            out_specs=pl.BlockSpec(memory_space=pltpu.MemorySpace.VMEM),
        )(yT, w1t, b1c, w2c, b2c)
        return outT[:, :B].T

    # Large batch: grid over the lane (batch) axis with big tiles so the
    # HBM<->VMEM DMA is double-buffered and every store is a full-lane vst.
    # "parallel" lets v7x's two TensorCores split the grid.
    tile = max(_LANE, (min(lane_tile, Bp128) // _LANE) * _LANE)
    Bp = pl.cdiv(B, tile) * tile
    yT = (jnp.pad(y, ((0, Bp - B), (0, 0))) if Bp != B else y).T

    # VMEM budget: double-buffered in/out tiles + the [H, tile] f32 hidden.
    # Bump past v5e's 16 MiB scoped default only when needed; stays well under
    # v7x's 64 MiB physical VMEM.
    work_bytes = 4 * (DI + DO) * tile * itemsize + H * tile * 4
    cp = {"dimension_semantics": ("parallel",)}
    if work_bytes > (12 << 20):
        cp["vmem_limit_bytes"] = int(min(work_bytes * 3 // 2, 48 << 20))

    outT = pl.pallas_call(
        odefunc_cols_kernel,
        out_shape=jax.ShapeDtypeStruct((DO, Bp), y.dtype),
        grid=(Bp // tile,),
        in_specs=[
            pl.BlockSpec((DI, tile), lambda i: (0, i)),
            pl.BlockSpec((H, DI), lambda i: (0, 0)),
            pl.BlockSpec((H, 1), lambda i: (0, 0)),
            pl.BlockSpec((H, DO), lambda i: (0, 0)),
            pl.BlockSpec((DO, 1), lambda i: (0, 0)),
        ],
        out_specs=pl.BlockSpec((DO, tile), lambda i: (0, i)),
        compiler_params=pltpu.CompilerParams(**cp),
    )(yT, w1t, b1c, w2c, b2c)
    return outT[:, :B].T


def odeint_euler_fused(y0, t0, dt, n_steps, w1, b1, w2t, b2, *,
                       lane_tile=256, unroll=8):
    """Integrate dy/dt = net(y) with explicit Euler, fully fused into ONE
    pallas_call per lane-tile: weights stay VMEM/vreg-resident, launch/DMA
    overhead is amortized over n_steps, and the batch-axis grid ("parallel")
    lets v7x's second TensorCore take half the trajectories."""
    del t0  # the torch module ignores t (autonomous RHS)
    B, DI = y0.shape
    H = w1.shape[1]
    DO = w2t.shape[0]
    assert DI == 2 and DO == 2, "kernel is specialized for the 2->32->2 MLP"

    w1t, b1c, w2c, b2c = _col_params(w1, b1, w2t, b2)

    tile = min(int(lane_tile), pl.cdiv(B, _LANE) * _LANE)
    tile = max(_LANE, (tile // _LANE) * _LANE)
    Bp = pl.cdiv(B, tile) * tile
    y0T = (jnp.pad(y0, ((0, Bp - B), (0, 0))) if Bp != B else y0).T

    n_steps = int(n_steps)
    kernel = functools.partial(
        fused_euler_cols_kernel, n_steps=n_steps, dt=float(dt),
        unroll=max(1, min(int(unroll), n_steps)))
    # TODO(synk): n_steps/dt are baked in via partial, so each (n_steps, dt)
    # pair recompiles; fine for fixed-step solvers, pass dt via SMEM for sweeps.

    outT = pl.pallas_call(
        kernel,
        out_shape=jax.ShapeDtypeStruct((DO, Bp), y0.dtype),
        grid=(Bp // tile,),
        in_specs=[
            pl.BlockSpec((DI, tile), lambda i: (0, i)),
            pl.BlockSpec((H, DI), lambda i: (0, 0)),
            pl.BlockSpec((H, 1), lambda i: (0, 0)),
            pl.BlockSpec((H, DO), lambda i: (0, 0)),
            pl.BlockSpec((DO, 1), lambda i: (0, 0)),
        ],
        out_specs=pl.BlockSpec((DO, tile), lambda i: (0, i)),
        compiler_params=pltpu.CompilerParams(
            dimension_semantics=("parallel",)),
    )(y0T, w1t, b1c, w2c, b2c)
    return outT[:, :B].T


def init_params(key, in_dim=2, hidden=32, out_dim=2, dtype=jnp.float32):
    """torch.nn.Linear-style init U(-1/sqrt(fan_in), 1/sqrt(fan_in))."""
    k1, k2, k3, k4 = jax.random.split(key, 4)
    lim1 = 1.0 / (in_dim ** 0.5)
    lim2 = 1.0 / (hidden ** 0.5)
    w1 = jax.random.uniform(k1, (in_dim, hidden), dtype, -lim1, lim1)    # [in, hidden]
    b1 = jax.random.uniform(k2, (1, hidden), dtype, -lim1, lim1)         # [1, hidden]
    w2t = jax.random.uniform(k3, (out_dim, hidden), dtype, -lim2, lim2)  # [out, hidden]
    b2 = jax.random.uniform(k4, (1, out_dim), dtype, -lim2, lim2)        # [1, out]
    return w1, b1, w2t, b2


if __name__ == "__main__":
    key = jax.random.PRNGKey(0)
    kp, ky, kb, kc = jax.random.split(key, 4)

    w1, b1, w2t, b2 = init_params(kp)
    HI = jax.lax.Precision.HIGHEST

    def rhs_ref(y):
        h = jnp.tanh(jnp.dot(y, w1, precision=HI) + b1)
        return jnp.dot(h, w2t.T, precision=HI) + b2

    t = jnp.float32(0.0)  # unused, matches torch signature

    # 1) tiny batch -> flat row-layout path
    B = 8
    y = jax.random.uniform(ky, (B, 2), jnp.float32, 0.0, 2.0)
    out = jax.block_until_ready(odefunc_forward(t, y, w1, b1, w2t, b2))
    assert out.shape == (B, 2)
    assert jnp.allclose(out, rhs_ref(y), atol=1e-5, rtol=1e-5)

    # 2) medium batch -> lane-dense transposed flat path
    Bb = 512
    yb = jax.random.uniform(kb, (Bb, 2), jnp.float32, 0.0, 2.0)
    outb = jax.block_until_ready(odefunc_forward(t, yb, w1, b1, w2t, b2))
    assert outb.shape == (Bb, 2)
    assert jnp.allclose(outb, rhs_ref(yb), atol=1e-5, rtol=1e-5)

    # 3) force the tiled grid path (tiny tile only to exercise the code path;
    #    production default keeps ~64K-lane tiles)
    outg = jax.block_until_ready(
        odefunc_forward(t, yb, w1, b1, w2t, b2, flat_vmem_bytes=0, lane_tile=128))
    assert jnp.allclose(outg, rhs_ref(yb), atol=1e-5, rtol=1e-5)

    # 4) fused fixed-step Euler, B=8 (pads to one 128-lane tile)
    n_steps, dt = 64, 0.01
    yT = jax.block_until_ready(
        odeint_euler_fused(y, 0.0, dt, n_steps, w1, b1, w2t, b2))
    y_chk = y
    for _ in range(n_steps):
        y_chk = y_chk + dt * rhs_ref(y_chk)
    assert yT.shape == (B, 2)
    assert jnp.allclose(yT, y_chk, atol=1e-4, rtol=1e-4)

    # 5) fused Euler over a multi-tile parallel grid, non-multiple-of-128 batch
    Bc = 300
    yc = jax.random.uniform(kc, (Bc, 2), jnp.float32, 0.0, 2.0)
    yTc = jax.block_until_ready(
        odeint_euler_fused(yc, 0.0, dt, n_steps, w1, b1, w2t, b2, lane_tile=128))
    yc_chk = yc
    for _ in range(n_steps):
        yc_chk = yc_chk + dt * rhs_ref(yc_chk)
    assert yTc.shape == (Bc, 2)
    assert jnp.allclose(yTc, yc_chk, atol=1e-4, rtol=1e-4)

    print("KERNEL_OK")
</pallas_src>

<mosaic_0001>
module attributes {stable_mosaic.version = 11 : i64} {
  func.func @odefunc_rows_kernel(%arg0: memref<8x2xf32, #tpu.memory_space<vmem>>, %arg1: memref<2x32xf32, #tpu.memory_space<vmem>>, %arg2: memref<1x32xf32, #tpu.memory_space<vmem>>, %arg3: memref<2x32xf32, #tpu.memory_space<vmem>>, %arg4: memref<1x2xf32, #tpu.memory_space<vmem>>, %arg5: memref<8x2xf32, #tpu.memory_space<vmem>>) attributes {dimension_semantics = [], scalar_prefetch = 0 : i64, scratch_operands = 0 : i64, tpu.core_type = #tpu.core_type<tc>} {
    %c0 = arith.constant 0 : index
    %c0_0 = arith.constant 0 : index
    %0 = vector.load %arg0[%c0, %c0_0] : memref<8x2xf32, #tpu.memory_space<vmem>>, vector<8x2xf32>
    %c0_1 = arith.constant 0 : index
    %c0_2 = arith.constant 0 : index
    %1 = vector.load %arg1[%c0_1, %c0_2] : memref<2x32xf32, #tpu.memory_space<vmem>>, vector<2x32xf32>
    %c0_3 = arith.constant 0 : index
    %c0_4 = arith.constant 0 : index
    %2 = vector.load %arg2[%c0_3, %c0_4] : memref<1x32xf32, #tpu.memory_space<vmem>>, vector<1x32xf32>
    %c0_5 = arith.constant 0 : index
    %c0_6 = arith.constant 0 : index
    %3 = vector.load %arg3[%c0_5, %c0_6] : memref<2x32xf32, #tpu.memory_space<vmem>>, vector<2x32xf32>
    %c0_7 = arith.constant 0 : index
    %c0_8 = arith.constant 0 : index
    %4 = vector.load %arg4[%c0_7, %c0_8] : memref<1x2xf32, #tpu.memory_space<vmem>>, vector<1x2xf32>
    %5 = vector.extract_strided_slice %0 {offsets = [0, 0], sizes = [8, 1], strides = [1, 1]} : vector<8x2xf32> to vector<8x1xf32>
    %6 = vector.extract_strided_slice %1 {offsets = [0, 0], sizes = [1, 32], strides = [1, 1]} : vector<2x32xf32> to vector<1x32xf32>
    %7 = vector.broadcast %5 : vector<8x1xf32> to vector<8x32xf32>
    %8 = vector.broadcast %6 : vector<1x32xf32> to vector<8x32xf32>
    %9 = arith.mulf %7, %8 : vector<8x32xf32>
    %10 = vector.extract_strided_slice %0 {offsets = [0, 1], sizes = [8, 1], strides = [1, 1]} : vector<8x2xf32> to vector<8x1xf32>
    %11 = vector.extract_strided_slice %1 {offsets = [1, 0], sizes = [1, 32], strides = [1, 1]} : vector<2x32xf32> to vector<1x32xf32>
    %12 = vector.broadcast %10 : vector<8x1xf32> to vector<8x32xf32>
    %13 = vector.broadcast %11 : vector<1x32xf32> to vector<8x32xf32>
    %14 = arith.mulf %12, %13 : vector<8x32xf32>
    %15 = arith.addf %9, %14 : vector<8x32xf32>
    %16 = vector.broadcast %2 : vector<1x32xf32> to vector<8x32xf32>
    %17 = arith.addf %15, %16 : vector<8x32xf32>
    %18 = math.tanh %17 : vector<8x32xf32>
    %19 = vector.extract_strided_slice %3 {offsets = [0, 0], sizes = [1, 32], strides = [1, 1]} : vector<2x32xf32> to vector<1x32xf32>
    %20 = vector.broadcast %19 : vector<1x32xf32> to vector<8x32xf32>
    %21 = arith.mulf %18, %20 : vector<8x32xf32>
    %cst = arith.constant dense<0.000000e+00> : vector<8xf32>
    %22 = vector.multi_reduction <add>, %21, %cst [1] : vector<8x32xf32> to vector<8xf32>
    %23 = vector.shape_cast %22 : vector<8xf32> to vector<8x1xf32>
    %24 = vector.extract_strided_slice %3 {offsets = [1, 0], sizes = [1, 32], strides = [1, 1]} : vector<2x32xf32> to vector<1x32xf32>
    %25 = vector.broadcast %24 : vector<1x32xf32> to vector<8x32xf32>
    %26 = arith.mulf %18, %25 : vector<8x32xf32>
    %cst_9 = arith.constant dense<0.000000e+00> : vector<8xf32>
    %27 = vector.multi_reduction <add>, %26, %cst_9 [1] : vector<8x32xf32> to vector<8xf32>
    %28 = vector.shape_cast %27 : vector<8xf32> to vector<8x1xf32>
    %29 = tpu.concatenate %23, %28 in 1 : vector<8x1xf32>, vector<8x1xf32> -> vector<8x2xf32>
    %30 = vector.broadcast %4 : vector<1x2xf32> to vector<8x2xf32>
    %31 = arith.addf %29, %30 : vector<8x2xf32>
    %c0_10 = arith.constant 0 : index
    %c0_11 = arith.constant 0 : index
    %32 = vector.load %arg5[%c0_10, %c0_11] : memref<8x2xf32, #tpu.memory_space<vmem>>, vector<8x2xf32>
    tpu.vector_store %arg5[%c0_10, %c0_11], %31 {strides = array<i32>} : memref<8x2xf32, #tpu.memory_space<vmem>>, vector<8x2xf32>,
    return
  }
}

</mosaic_0001>

<bundles_post_ra>
// kernel: tpu_custom_call.1
= control target key start
LH: loop header
LB: loop body
LE: loop exit
PB: predicated region body
PF: predicated region fallthrough
CT: control target
= control target key end

     0   :  { %v75_v0 = vmov 0   ;;  %v76_v2 = vmov 1   ;;  %vm46_vm0 = vcmask 261120   ;;  %vm55_vm1 = vcmask 7168   ;;  %s125_s0 = inlined_call_operand.vmem [shape: f32[8,2], index: 0, kind: input, shape index: {}]   ;;  %s126_s2 = inlined_call_operand.vmem [shape: f32[1,32], index: 2, kind: input, shape index: {}]   ;;  %s127_s1 = inlined_call_operand.vmem [shape: f32[2,32], index: 1, kind: input, shape index: {}]   ;;  %s128_s3 = inlined_call_operand.vmem [shape: f32[2,32], index: 3, kind: input, shape index: {}]   ;;  %s129_s4 = inlined_call_operand.vmem [shape: f32[1,2], index: 4, kind: input, shape index: {}]   ;;  %s130_s5 = inlined_call_operand.vmem [shape: f32[8,2], index: 5, kind: output, shape index: {}]  }
   0x1   :  { %69 = vset.pattern.permute.xlu0 %v75_v0  ;;  %v20_v1 = vld [vmem:[%s125_s0] sm:$0xff]  ;;  %vm61_vm2 = vcmask 15360  }
   0x2   :  { %27 = vperm.xlu0 %69, %v20_v1   ;;  %v21_v4 = vld [vmem:[%s127_s1] sm:$0x3] }
   0x3   :  { %v30_v5 = vperm.slane %v21_v4, 0  ;;  %v36_v6 = vperm.slane %v21_v4, 1  ;;  %v71_v9 = vld [vmem:[%s126_s2] ss:$0 sm:$0xff] }
   0x4   :  { %v23_v13 = vld [vmem:[%s128_s3] sm:$0x3] }
   0x5   :  { %v44_v14 = vperm.slane %v23_v13, 0  ;;  %v50_v18 = vperm.slane %v23_v13, 1  ;;  %v72_v22 = vld [vmem:[%s129_s4] ss:$0 sm:$0xff] }
   0xa   :  { %70 = vset.pattern.permute.xlu0 %v76_v2 }
   0xb   :  { %33 = vperm.xlu0 %70, %v20_v1  }
  0x74   :  { %v28_v3 = vpop.permute.xlu0 %27 }
  0x75   :  { %v31_v8 = vmul.f32 %v30_v5, %v28_v3 }
  0x7d   :  { %v34_v7 = vpop.permute.xlu0 %33 }
  0x7e   :  { %v37_v10 = vmul.f32 %v36_v6, %v34_v7 }
  0x80   :  { %v38_v11 = vadd.f32 %v37_v10, %v31_v8 }
  0x82   :  { %v42_v12 = vadd.f32 %v71_v9, %v38_v11 }
  0x84   :  { %73 = vtanh.f32 %v42_v12 }
  0x8a   :  { %v74_v15 = vpop.eup %73 }
  0x8b   :  { %v45_v16 = vmul.f32 %v74_v15, %v44_v14  ;;  %v51_v19 = vmul.f32 %v74_v15, %v50_v18 }
  0x8d   :  { %v47_v17 = vsel %vm46_vm0, %v45_v16, 0.0  ;;  %v52_v20 = vsel %vm46_vm0, %v51_v19, 0.0 }
  0x8e   :  { %48 = vadd.xlane.f32.xlu1 %v47_v17 }
  0x96   :  { %53 = vadd.xlane.f32.xlu1 %v52_v20 }
 0x101   :  { %v49_v21 = vpop.xlane.xlu1 %48 }
 0x109   :  { %v54_v23 = vpop.xlane.xlu1 %53 }
 0x10a   :  { %v56_v24 = vsel %vm55_vm1, %v49_v21, %v54_v23 }
 0x10b   :  { %v60_v25 = vadd.f32 %v72_v22, %v56_v24 }
 0x10d   :  { %62 = vst.msk [vmem:[%s130_s5] sm:$0xff] %vm61_vm2, %v60_v25 }

</bundles_post_ra>
